<compile_context>
chip_gen: v7x
topology: tpu7x:2x2x1
jax: 0.10.0
libtpu: 0.0.40
codegen_flags: <defaults>
</compile_context>

<pallas_src>
import functools

import jax
import jax.numpy as jnp
import numpy as np
from jax.experimental import pallas as pl
from jax.experimental.pallas import tpu as pltpu

_LANE = 128


# ---------------------------------------------------------------------------
# Kernel
# ---------------------------------------------------------------------------
def _quant_act_kernel(x_ref, p_ref, o_ref, *, min_int, max_int, bin_output):
    # Upcast in-kernel (free VPU filler for a mem-bound kernel); compute in f32.
    x = x_ref[...].astype(jnp.float32)            # (TILE_R, TILE_L), lane-dense

    # Per-row folded parameters (broadcast along lanes).
    pre_a = p_ref[:, 0:1]                         # (gamma/std) / scale
    pre_b = p_ref[:, 1:2]                         # (beta - mean*gamma/std) / scale

    # Folded BatchNorm + divide-by-scale, then integer quantization.
    q_int = jnp.clip(jnp.round(x * pre_a + pre_b), min_int, max_int)

    if bin_output:
        # forward(): torch.round(x / s) -> integer codes (== q_int exactly).
        # TODO(synk): PyTorch returns int64; kernel emits int8 codes (4-bit
        # values, no information loss) to cut output writeback bandwidth 8x.
        o_ref[...] = q_int.astype(jnp.int8)
    else:
        post_a = p_ref[:, 2:3]                    # post_scale * scale (scale folded)
        post_b = p_ref[:, 3:4]                    # post_shift
        o_ref[...] = (q_int * post_a + post_b).astype(o_ref.dtype)


# ---------------------------------------------------------------------------
# Tiling
# ---------------------------------------------------------------------------
def _cdiv(a, b):
    return -(-a // b)


def _round_up(a, b):
    return ((a + b - 1) // b) * b


def _choose_tiles(R, L, in_bytes, out_bytes, row_align, target_bytes):
    """Pick (tile_r, tile_l) so one (in + out) grid step stays near target_bytes.

    Blocks are legal if each of the last two dims is a multiple of
    (row_align, 128) or equals the full array dim; ragged trailing blocks are
    handled by Pallas (masked edge stores) via grid = cdiv(dim, tile).
    """
    bpe = in_bytes + out_bytes
    tile_r_unit = R if R <= row_align else row_align

    if tile_r_unit * L * bpe <= target_bytes:
        # Keep the lane axis whole (lane-dense stores); grow rows to budget.
        tile_l = L
        if R <= row_align:
            tile_r = R                         # full row dim is always legal
        else:
            rows = max(row_align, target_bytes // (L * bpe))
            tile_r = max(row_align, (rows // row_align) * row_align)
            tile_r = min(tile_r, _round_up(R, row_align))
            # Guarantee >= 2 row steps so v7x's second TensorCore gets work.
            half = max(row_align, _round_up(_cdiv(R, 2), row_align))
            tile_r = min(tile_r, half)
    else:
        # Very large spatial extent: tile the lane axis too so per-step VMEM
        # stays bounded on every generation (incl. v7x's 64 MiB).
        tile_r = tile_r_unit
        lanes = max(_LANE, target_bytes // (tile_r * bpe))
        tile_l = max(_LANE, (lanes // _LANE) * _LANE)
        if tile_l >= L:
            tile_l = L
    return int(tile_r), int(tile_l)


# ---------------------------------------------------------------------------
# Wrapper
# ---------------------------------------------------------------------------
def quant_brevitas_activation(x_nchw, bn_gamma, bn_beta, bn_mean, bn_var,
                              post_scale, post_shift, *,
                              scale=0.125, bits=4, signed=True,
                              narrow_range=False, eps=1e-5, bin_output=False):
    N, C, H, W = x_nchw.shape
    R, L = N * C, H * W

    # Contiguous (free) reshape: rows = (n, c) pairs, lanes = spatial.
    # Input stays in its native dtype; the kernel upcasts.
    x2d = x_nchw.reshape(R, L)
    in_bytes = x2d.dtype.itemsize

    # Fold eval-mode BatchNorm and the quant scale into per-channel affines.
    inv_std = 1.0 / jnp.sqrt(bn_var.astype(jnp.float32) + eps)
    pre_a = bn_gamma.astype(jnp.float32) * inv_std
    pre_b = bn_beta.astype(jnp.float32) - bn_mean.astype(jnp.float32) * pre_a
    pre_a_s = pre_a / scale                             # y/s = x*pre_a_s + pre_b_s
    pre_b_s = pre_b / scale
    post_a_s = post_scale.astype(jnp.float32) * scale   # q*post_scale = q_int*post_a_s
    post_b = post_shift.astype(jnp.float32)

    # Per-channel -> per-row (row r has channel r % C); one stacked (R, 4)
    # array so a single small DMA per grid step carries all four params.
    params_c = jnp.stack([pre_a_s, pre_b_s, post_a_s, post_b], axis=-1)   # (C, 4)
    params = jnp.tile(params_c, (N, 1))                                   # (R, 4)

    # Integer state-space bounds (matches get_int_state_space).
    if signed:
        min_int = -(2 ** (bits - 1)) + int(narrow_range)
        max_int = 2 ** (bits - 1) - 1
    else:
        min_int = 0
        max_int = 2 ** bits - 1 - int(narrow_range)

    out_dtype = jnp.int8 if bin_output else x2d.dtype
    out_bytes = jnp.dtype(out_dtype).itemsize
    row_align = 32 if bin_output else 8        # int8 native sublane tile is (32, 128)

    # Generation-aware VMEM budget: 128 MiB (v5e/v6e) vs 64 MiB/TC (v7x).
    try:
        vmem_cap = int(getattr(pltpu.get_tpu_info(), "vmem_capacity_bytes",
                               64 * 1024 * 1024))
    except Exception:  # pragma: no cover - defensive: fall back to v7x-safe cap
        vmem_cap = 64 * 1024 * 1024
    vmem_limit = int(min(64 * 1024 * 1024, (vmem_cap * 3) // 4))   # 64 MiB / 48 MiB
    # ~8 MiB of (in+out) per step -> ~16 MiB double-buffered, fits all gens.
    tile_target = int(min(8 * 1024 * 1024, vmem_limit // 4))

    tile_r, tile_l = _choose_tiles(R, L, in_bytes, out_bytes, row_align, tile_target)
    nr = _cdiv(R, tile_r)
    nl = _cdiv(L, tile_l)

    # Tiny layers only: deepen input buffering to hide exposed per-step DMA
    # overhead. Never triggers when the big-tile path applies.
    step_bytes = tile_r * tile_l * (in_bytes + out_bytes)
    if nr * nl >= 4 and step_bytes < (2 * 1024 * 1024):
        x_spec = pl.BlockSpec((tile_r, tile_l), lambda i, j: (i, j),
                              pipeline_mode=pl.Buffered(3))
    else:
        x_spec = pl.BlockSpec((tile_r, tile_l), lambda i, j: (i, j))

    kernel = functools.partial(
        _quant_act_kernel,
        min_int=float(min_int),
        max_int=float(max_int),
        bin_output=bin_output,
    )

    cost = pl.CostEstimate(
        flops=int(7 * R * L),
        transcendentals=0,
        bytes_accessed=int(R * L * (in_bytes + out_bytes) + R * 4 * 4),
    )

    out2d = pl.pallas_call(
        kernel,
        out_shape=jax.ShapeDtypeStruct((R, L), out_dtype),
        grid=(nr, nl),
        in_specs=[
            x_spec,
            pl.BlockSpec((tile_r, 4), lambda i, j: (i, 0)),
        ],
        out_specs=pl.BlockSpec((tile_r, tile_l), lambda i, j: (i, j)),
        compiler_params=pltpu.CompilerParams(
            dimension_semantics=("parallel", "parallel"),   # v7x: 2 TCs share rows
            vmem_limit_bytes=vmem_limit,
        ),
        cost_estimate=cost,
    )(x2d, params)

    # Free reshape back to the module's NCHW layout (no pad/slice copies).
    return out2d.reshape(N, C, H, W)


# ---------------------------------------------------------------------------
# Reference + test
# ---------------------------------------------------------------------------
def _reference(x_nchw, bn_gamma, bn_beta, bn_mean, bn_var, post_scale, post_shift,
               *, scale, bits, signed, narrow_range, eps, bin_output):
    """Pure-JAX reference in the PyTorch op order (unfolded)."""
    g = bn_gamma[None, :, None, None]
    b = bn_beta[None, :, None, None]
    m = bn_mean[None, :, None, None]
    v = bn_var[None, :, None, None]
    y = (x_nchw - m) / jnp.sqrt(v + eps) * g + b
    if signed:
        min_int = -(2 ** (bits - 1)) + int(narrow_range)
        max_int = 2 ** (bits - 1) - 1
    else:
        min_int = 0
        max_int = 2 ** bits - 1 - int(narrow_range)
    q = jnp.clip(jnp.round(y / scale), min_int, max_int) * scale
    if bin_output:
        return jnp.round(q / scale).astype(jnp.int32)
    return q * post_scale[None, :, None, None] + post_shift[None, :, None, None]


def _assert_codes_close(got, want, code_step, what):
    """Exact match, tolerating rare one-code flips at round-half / clip
    boundaries caused by folding the affines (documented FP reassociation)."""
    got = np.asarray(got, dtype=np.float64)
    want = np.asarray(want, dtype=np.float64)
    diff = np.abs(got - want)
    assert diff.max() <= code_step + 1e-4, f"{what}: max diff {diff.max()}"
    frac_exact = float(np.mean(diff <= 1e-4))
    assert frac_exact >= 0.999, f"{what}: only {frac_exact:.5f} exact"


if __name__ == "__main__":
    key = jax.random.PRNGKey(0)
    common = dict(scale=0.125, bits=4, signed=True, narrow_range=False, eps=1e-5)

    def make_params(C):
        c = jnp.arange(C, dtype=jnp.float32)
        return dict(
            bn_gamma=1.0 + 0.1 * (c % 8),
            bn_beta=0.05 * (c % 8),
            bn_mean=0.01 * (c % 8),
            bn_var=1.0 + 0.02 * (c % 8),
            post_scale=0.5 + 0.1 * (c % 8),
            post_shift=0.1 + 0.0 * c,
        )

    shapes = [
        (2, 4, 16, 16),     # module-scale case (single grid step)
        (2, 130, 13, 13),   # ragged row blocks + non-multiple-of-128 lane width
    ]
    for shape in shapes:
        N, C, H, W = shape
        key, sub = jax.random.split(key)
        x = jax.random.normal(sub, shape, dtype=jnp.float32)
        p = make_params(C)

        # float_output() path
        y_float = quant_brevitas_activation(x, bin_output=False, **p, **common)
        # bin_output() path
        y_bin = quant_brevitas_activation(x, bin_output=True, **p, **common)
        jax.block_until_ready((y_float, y_bin))

        ref_float = _reference(x, bin_output=False, **p, **common)
        ref_bin = _reference(x, bin_output=True, **p, **common)

        assert y_float.shape == shape and y_float.dtype == jnp.float32
        assert y_bin.shape == shape and y_bin.dtype == jnp.int8

        code_step = common["scale"] * float(jnp.max(p["post_scale"]))
        _assert_codes_close(y_float, ref_float, code_step, f"float {shape}")
        _assert_codes_close(np.asarray(y_bin).astype(np.int32), ref_bin, 1.0,
                            f"bin {shape}")

    print("KERNEL_OK")
</pallas_src>

<mosaic_0001>
module attributes {stable_mosaic.version = 11 : i64} {
  func.func @_quant_act_kernel(%arg0: i32, %arg1: i32, %arg2: memref<8x256xf32, #tpu.memory_space<vmem>>, %arg3: memref<8x4xf32, #tpu.memory_space<vmem>>, %arg4: memref<8x256xf32, #tpu.memory_space<vmem>>) attributes {dimension_semantics = [#tpu.dimension_semantics<parallel>, #tpu.dimension_semantics<parallel>], iteration_bounds = array<i64: 1, 1>, scalar_prefetch = 0 : i64, scratch_operands = 0 : i64, tpu.core_type = #tpu.core_type<tc>, window_params = [{transform_indices = @transform_0, window_bounds = array<i64: 8, 256>}, {transform_indices = @transform_1, window_bounds = array<i64: 8, 4>}, {transform_indices = @transform_2, window_bounds = array<i64: 8, 256>}]} {
    %c0 = arith.constant 0 : index
    %c0_0 = arith.constant 0 : index
    %0 = vector.load %arg2[%c0, %c0_0] : memref<8x256xf32, #tpu.memory_space<vmem>>, vector<8x256xf32>
    %c0_1 = arith.constant 0 : index
    %c0_2 = arith.constant 0 : index
    %1 = vector.load %arg3[%c0_1, %c0_2] : memref<8x4xf32, #tpu.memory_space<vmem>>, vector<8x1xf32>
    %c0_3 = arith.constant 0 : index
    %c1 = arith.constant 1 : index
    %2 = vector.load %arg3[%c0_3, %c1] : memref<8x4xf32, #tpu.memory_space<vmem>>, vector<8x1xf32>
    %3 = vector.broadcast %1 : vector<8x1xf32> to vector<8x256xf32>
    %4 = arith.mulf %0, %3 : vector<8x256xf32>
    %5 = vector.broadcast %2 : vector<8x1xf32> to vector<8x256xf32>
    %6 = arith.addf %4, %5 : vector<8x256xf32>
    %7 = math.roundeven %6 : vector<8x256xf32>
    %cst = arith.constant -8.000000e+00 : f32
    %cst_4 = arith.constant 7.000000e+00 : f32
    %8 = vector.broadcast %cst : f32 to vector<8x256xf32>
    %9 = arith.maximumf %8, %7 : vector<8x256xf32>
    %10 = vector.broadcast %cst_4 : f32 to vector<8x256xf32>
    %11 = arith.minimumf %10, %9 : vector<8x256xf32>
    %c0_5 = arith.constant 0 : index
    %c2 = arith.constant 2 : index
    %12 = vector.load %arg3[%c0_5, %c2] : memref<8x4xf32, #tpu.memory_space<vmem>>, vector<8x1xf32>
    %c0_6 = arith.constant 0 : index
    %c3 = arith.constant 3 : index
    %13 = vector.load %arg3[%c0_6, %c3] : memref<8x4xf32, #tpu.memory_space<vmem>>, vector<8x1xf32>
    %14 = vector.broadcast %12 : vector<8x1xf32> to vector<8x256xf32>
    %15 = arith.mulf %11, %14 : vector<8x256xf32>
    %16 = vector.broadcast %13 : vector<8x1xf32> to vector<8x256xf32>
    %17 = arith.addf %15, %16 : vector<8x256xf32>
    %c0_7 = arith.constant 0 : index
    %c0_8 = arith.constant 0 : index
    %18 = vector.load %arg4[%c0_7, %c0_8] : memref<8x256xf32, #tpu.memory_space<vmem>>, vector<8x256xf32>
    tpu.vector_store %arg4[%c0_7, %c0_8], %17 {strides = array<i32>} : memref<8x256xf32, #tpu.memory_space<vmem>>, vector<8x256xf32>,
    return
  }
  func.func @transform_0(%arg0: i32, %arg1: i32) -> (i32, i32) {
    %c0_i32 = arith.constant 0 : i32
    return %arg0, %arg1 : i32, i32
  }
  func.func @transform_1(%arg0: i32, %arg1: i32) -> (i32, i32) {
    %c0_i32 = arith.constant 0 : i32
    %c0_i32_0 = arith.constant 0 : i32
    return %arg0, %c0_i32 : i32, i32
  }
  func.func @transform_2(%arg0: i32, %arg1: i32) -> (i32, i32) {
    %c0_i32 = arith.constant 0 : i32
    return %arg0, %arg1 : i32, i32
  }
}

</mosaic_0001>

<bundles_post_ra>
// kernel: tpu_custom_call.1
= control target key start
LH: loop header
LB: loop body
LE: loop exit
PB: predicated region body
PF: predicated region fallthrough
CT: control target
= control target key end

     0   :  { %7 = vsyncpa [#allocation3], 0  ;;  %s184_s0 = inlined_call_operand.hbm [shape: f32[8,256], index: 0, kind: input, shape index: {}]   ;;  %s185_s1 = inlined_call_operand.vmem [shape: f32[8,4], index: 1, kind: input, shape index: {}]   ;;  %s186_s2 = inlined_call_operand.hbm [shape: f32[8,256], index: 2, kind: output, shape index: {}]  }
   0x1   :  { %8 = vsyncpa [#allocation4], 0  ;;  %s136_s9 = smov [#allocation2]   ;;  %s88_s13 = scalar_lea.hbm %s184_s0, 256 }
   0x2   :  { %s15_s10 = sshll.u32 %s136_s9, 4  ;;  %p89_p0 = scmp.ne.s32.totalorder %s184_s0, %s88_s13  ;;  %s16_s10 = int_to_ptr.vmem [resolvable:$true] %s15_s10 }
   0x3   :  { %p92_p1 = scmp.lt.u32.totalorder %s88_s13, %s184_s0 }
   0x5   :  { %p94_p2 = pnand %p92_p1, %p89_p0 }
   0x7   :  { %97 = shalt.err (!%p94_p2)
}
   0x8   :  { %s98_s18 = scalar_lea.vmem %s16_s10, 256  ;;  %p103_p4 = scmp.lt.s32.totalorder %s16_s10, %s16_s10 }
   0x9   :  { %p99_p3 = scmp.ne.s32.totalorder %s16_s10, %s98_s18  ;;  %p104_p5 = scmp.lt.s32.totalorder %s98_s18, %s98_s18 }
   0xb   :  { %p105_p6 = por %p104_p5, %p103_p4 }
   0xd   :  { %p106_p7 = pnand %p105_p6, %p99_p3 }
   0xf   :  { %109 = shalt.err (!%p106_p7)
}
  0x10   :  { %18 = dma.hbm_to_vmem [thread:$0]  %s184_s0, 256, %s16_s10, [#allocation3]  }
  0x11   :  { %132 = dma.done.wait [#allocation3], 256  }
  0x12   :  { %133 = vsyncadd [#allocation3], 4294967040  ;;  %v137_v0 = vmov 0   ;;  %v138_v1 = vmov 2   ;;  %v26_v2 = vld [vmem:[%s185_s1] sm:$0xff]  ;;  %v139_v3 = vmov 1  }
  0x13   :  { %83 = vset.pattern.permute.xlu0 %v137_v0  ;;  %85 = vset.pattern.permute.xlu1 %v138_v1  ;;  %v140_v4 = vmov 3   ;;  %v24_v6 = vld [vmem:[#allocation2] sm:$0xff]  ;;  %v25_v7 = vld [vmem:[#allocation2 + $0x8] sm:$0xff]  ;;  %s141_s0 = smov [#allocation5]  }
  0x14   :  { %29 = vperm.xlu0 %83, %v26_v2   ;;  %47 = vperm.xlu1 %85, %v26_v2   ;;  %s66_s1 = sshll.u32 %s141_s0, 4  ;;  %s67_s1 = int_to_ptr.vmem [resolvable:$true] %s66_s1 }
  0x15   :  { %s110_s23 = scalar_lea.vmem %s67_s1, 256  ;;  %p115_p9 = scmp.lt.s32.totalorder %s67_s1, %s67_s1 }
  0x16   :  { %p111_p8 = scmp.ne.s32.totalorder %s67_s1, %s110_s23  ;;  %p116_p10 = scmp.lt.s32.totalorder %s110_s23, %s110_s23 }
  0x18   :  { %84 = vset.pattern.permute.xlu0 %v139_v3  ;;  %86 = vset.pattern.permute.xlu1 %v140_v4  ;;  %p117_p11 = por %p116_p10, %p115_p9 }
  0x19   :  { %35 = vperm.xlu0 %84, %v26_v2   ;;  %53 = vperm.xlu1 %86, %v26_v2  }
  0x1a   :  { %p118_p12 = pnand %p117_p11, %p111_p8 }
  0x1d   :  { %87 = vset.pattern.permute.xlu0 %v140_v4 }
  0x93   :  { %v30_v5 = vpop.permute.xlu0 %29  ;;  %v48_v13 = vpop.permute.xlu1 %47 }
  0x94   :  { %v32_v8 = vmul.f32 %v30_v5, %v24_v6  ;;  %v33_v9 = vmul.f32 %v30_v5, %v25_v7 }
  0x98   :  { %v36_v10 = vpop.permute.xlu0 %35  ;;  %v54_v20 = vpop.permute.xlu1 %53 }
  0x99   :  { %v38_v11 = vadd.f32 %v36_v10, %v32_v8  ;;  %v39_v12 = vadd.f32 %v36_v10, %v33_v9 }
  0x9b   :  { %v75_v14 = vround.rtne.f32 %v38_v11  ;;  %v76_v15 = vround.rtne.f32 %v39_v12 }
  0x9d   :  { %v42_v16 = vmax.f32 %v75_v14, -8.0  ;;  %v43_v17 = vmax.f32 %v76_v15, -8.0 }
  0x9f   :  { %v44_v18 = vmin.f32 %v42_v16, 7.0  ;;  %v45_v19 = vmin.f32 %v43_v17, 7.0 }
  0xa1   :  { %v50_v21 = vmul.f32 %v48_v13, %v44_v18  ;;  %v51_v22 = vmul.f32 %v48_v13, %v45_v19 }
  0xa3   :  { %v56_v23 = vadd.f32 %v54_v20, %v50_v21  ;;  %v57_v24 = vadd.f32 %v54_v20, %v51_v22 }
  0xa5   :  { %58 = vst [vmem:[#allocation5] sm:$0xff] %v56_v23  ;;  %59 = vst [vmem:[#allocation5 + $0x8] sm:$0xff] %v57_v24 }
  0xa6   :  { %121 = shalt.err (!%p118_p12)
}
  0xa7   :  { %s122_s26 = scalar_lea.hbm %s186_s2, 256 }
  0xa8   :  { %p123_p13 = scmp.ne.s32.totalorder %s186_s2, %s122_s26  ;;  %p126_p0 = scmp.lt.u32.totalorder %s122_s26, %s186_s2 }
  0xaa   :  { %p128_p1 = pnand %p126_p0, %p123_p13 }
  0xac   :  { %131 = shalt.err (!%p128_p1)
}
  0xad   :  { %69 = dma.vmem_to_hbm [thread:$0]  %s67_s1, 256, %s186_s2, [#allocation4]  }
  0xae   :  { %134 = dma.done.wait [#allocation4], 256  }
  0xaf   :  { %135 = vsyncadd [#allocation4], 4294967040 }
  0xb0   :  { %73 = vsyncpa [#allocation3], 1 }
  0xb1   :  { %74 = vsyncpa [#allocation4], 1 }

</bundles_post_ra>
